<compile_context>
chip_gen: v7x
topology: tpu7x:2x2x1
jax: 0.10.0
libtpu: 0.0.40
codegen_flags: <defaults>
</compile_context>

<pallas_src>
import functools

import jax
import jax.numpy as jnp
from jax import lax
from jax.experimental import pallas as pl
from jax.experimental.pallas import tpu as pltpu


def _round_up(x, m):
    return ((x + m - 1) // m) * m


def _tpu_generation():
    try:
        kind = jax.devices()[0].device_kind.lower()
    except Exception:
        return "unknown"
    if "7" in kind:
        return "v7x"
    if "v5" in kind and ("lite" in kind or "5e" in kind):
        return "v5e"
    if "v6" in kind:
        return "v6e"
    return "unknown"


def _est_vmem(tq, tk, d_pad, isz):
    # Double-buffered feature tiles + ~8 (TQ,TK) f32 in-body temporaries
    # (adc, exp, same, keep, pos, iotas, where outputs) + accumulators + headroom.
    return int(2 * tq * d_pad * isz
               + 2 * tk * d_pad * isz
               + 8 * tq * tk * 4
               + 3 * tq * 128 * 4
               + 4 * tq * 4
               + (2 << 20))


def _supcon_kernel(feat_q_ref, feat_k_ref, lab_q_ref, lab_k_ref, out_ref,
                   denom_acc, pos_acc, cnt_acc,
                   *, batch, block_q, block_k, acc_w, padded):
    qi = pl.program_id(0)
    ki = pl.program_id(1)
    nk = pl.num_programs(1)

    @pl.when(ki == 0)
    def _init():
        denom_acc[...] = jnp.zeros_like(denom_acc)
        pos_acc[...] = jnp.zeros_like(pos_acc)
        cnt_acc[...] = jnp.zeros_like(cnt_acc)

    # anchor_dot_contrast tile: (fq @ fk^T) on the MXU with f32 accumulation.
    # 1/temperature is pre-folded into the anchor features, so this IS the scaled logit.
    adc = lax.dot_general(
        feat_q_ref[...], feat_k_ref[...], (((1,), (1,)), ((), ())),
        preferred_element_type=jnp.float32)                       # (TQ, TK) f32

    same = lab_q_ref[...] == lab_k_ref[...]                       # (TQ, TK) bool

    n_chunks = block_k // acc_w

    def _accumulate(exp_adc, pos_adc, pos_cnt):
        # Lane-aligned (TQ, acc_w) partial sums -> full-width VPU adds; the cross-lane
        # reduction to (TQ, 1) is deferred to the finalize step.
        d = exp_adc[:, 0:acc_w]
        p = pos_adc[:, 0:acc_w]
        c = pos_cnt[:, 0:acc_w]
        for ci in range(1, n_chunks):
            sl = slice(ci * acc_w, (ci + 1) * acc_w)
            d = d + exp_adc[:, sl]
            p = p + pos_adc[:, sl]
            c = c + pos_cnt[:, sl]
        denom_acc[...] += d
        pos_acc[...] += p
        cnt_acc[...] += c

    # Tiles containing the self-pair diagonal (row block overlaps column block) and,
    # when padded, the last column tile need masking; everything else is maskless.
    chunks_per_row = block_q // block_k
    row0 = qi * chunks_per_row
    needs_mask = (ki >= row0) & (ki < row0 + chunks_per_row)
    if padded:
        needs_mask = needs_mask | (ki == nk - 1)

    @pl.when(needs_mask)
    def _masked_tile():
        row_g = qi * block_q + lax.broadcasted_iota(jnp.int32, (block_q, block_k), 0)
        col_g = ki * block_k + lax.broadcasted_iota(jnp.int32, (block_q, block_k), 1)
        keep = row_g != col_g
        if padded:
            keep = keep & (col_g < batch)
        pos = same & keep
        _accumulate(jnp.where(keep, jnp.exp(adc), 0.0),
                    jnp.where(pos, adc, 0.0),
                    pos.astype(jnp.float32))

    @pl.when(jnp.logical_not(needs_mask))
    def _fast_tile():
        _accumulate(jnp.exp(adc),
                    jnp.where(same, adc, 0.0),
                    same.astype(jnp.float32))

    @pl.when(ki == nk - 1)
    def _finalize():
        denom = denom_acc[...].sum(axis=1, keepdims=True) + 1e-8   # (TQ, 1)
        cnt = cnt_acc[...].sum(axis=1, keepdims=True)
        pos_sum = pos_acc[...].sum(axis=1, keepdims=True)
        # sum_j mask*(adc - log denom) = pos_sum - log(denom) * cnt
        numer = pos_sum - jnp.log(denom) * cnt
        out_ref[...] = numer / jnp.maximum(cnt, 1.0)               # mean_log_prob_pos


def supcon_loss(features, labels, temperature=0.07, *,
                block_q=None, block_k=None, compute_dtype=None):
    """Pallas implementation of SupConLoss.forward(features, labels).

    Pass compute_dtype=jnp.bfloat16 for native-rate MXU / halved HBM traffic (f32
    accumulation is kept); default keeps the input dtype for exact module semantics.
    """
    B, D = features.shape
    cdtype = features.dtype if compute_dtype is None else jnp.dtype(compute_dtype)
    inv_t = float(1.0 / temperature)

    gen = _tpu_generation()
    is_v7x = gen == "v7x"
    if is_v7x:
        tq_target, tk_target, vmem_cap = 1024, 256, 48 << 20
    elif gen == "v5e":
        tq_target, tk_target, vmem_cap = 256, 256, 100 << 20
    else:  # v6e / v5p / unknown
        tq_target, tk_target, vmem_cap = 1024, 256, 100 << 20
    if block_q is not None:
        tq_target = int(block_q)
    if block_k is not None:
        tk_target = int(block_k)

    labels = labels.astype(jnp.int32)
    # Fold 1/temperature into the anchor features, fused with the compute-dtype cast;
    # contrast features stay unscaled so adc == (f @ f^T) / temperature.
    feat_q = (features * inv_t).astype(cdtype)
    feat_k = features.astype(cdtype)
    isz = jnp.dtype(cdtype).itemsize

    # Pad the feature dim to a lane multiple (zero columns don't change the Gram).
    D_pad = _round_up(D, 128)

    # ---- tile selection ----------------------------------------------------
    if B <= 128 and block_q is None and block_k is None:
        TQ = TK = _round_up(B, 8)          # single tile; TK == B_pad satisfies tiling
        B_pad = TK
    else:
        TK = max(128, _round_up(tk_target, 128))
        B_pad = _round_up(B, TK)
        nk_total = B_pad // TK
        chunks = max(1, min(nk_total, tq_target // TK))
        if is_v7x and nk_total >= 2:
            chunks = min(chunks, nk_total // 2)      # keep nq >= 2 so both TCs work
        while chunks > 1 and _est_vmem(chunks * TK, TK, D_pad, isz) > vmem_cap:
            chunks -= 1
        while nk_total % chunks:
            chunks -= 1
        TQ = chunks * TK

    acc_w = min(128, TK)
    padded = B_pad != B

    fq, fk = feat_q, feat_k
    if padded or D_pad != D:
        fq = jnp.pad(fq, ((0, B_pad - B), (0, D_pad - D)))
        fk = jnp.pad(fk, ((0, B_pad - B), (0, D_pad - D)))
    lab = labels
    if padded:
        lab = jnp.pad(lab, (0, B_pad - B), constant_values=-1)
    lab_col = lab.reshape(B_pad, 1)
    lab_row = lab.reshape(1, B_pad)

    nq = B_pad // TQ
    nk = B_pad // TK

    vmem_limit = int(min(max(_est_vmem(TQ, TK, D_pad, isz), 32 << 20), vmem_cap))
    cost = pl.CostEstimate(
        flops=int(2 * B_pad * B_pad * D_pad),
        transcendentals=int(B_pad * B_pad),
        bytes_accessed=int((nq + 1) * B_pad * D_pad * isz + 3 * B_pad * 4))

    kernel = functools.partial(
        _supcon_kernel, batch=B, block_q=TQ, block_k=TK, acc_w=acc_w, padded=padded)

    out = pl.pallas_call(
        kernel,
        out_shape=jax.ShapeDtypeStruct((B_pad, 1), jnp.float32),
        grid_spec=pltpu.PrefetchScalarGridSpec(
            num_scalar_prefetch=0,
            grid=(nq, nk),
            in_specs=[
                pl.BlockSpec((TQ, D_pad), lambda qi, ki: (qi, 0)),  # anchor rows (scaled)
                pl.BlockSpec((TK, D_pad), lambda qi, ki: (ki, 0)),  # contrast rows
                pl.BlockSpec((TQ, 1), lambda qi, ki: (qi, 0)),      # labels (column)
                pl.BlockSpec((1, TK), lambda qi, ki: (0, ki)),      # labels (row)
            ],
            out_specs=pl.BlockSpec((TQ, 1), lambda qi, ki: (qi, 0)),
            scratch_shapes=[pltpu.VMEM((TQ, acc_w), jnp.float32)] * 3,
        ),
        compiler_params=pltpu.CompilerParams(
            dimension_semantics=("parallel", "arbitrary"),
            vmem_limit_bytes=vmem_limit,
        ),
        cost_estimate=cost,
    )(fq, fk, lab_col, lab_row)

    # -mean over the real (unpadded) anchors.
    return -jnp.mean(out[:B, 0])


def _supcon_loss_ref(features, labels, temperature=0.07):
    """Pure-JAX reference mirroring the PyTorch module exactly."""
    f = features
    B = f.shape[0]
    lab = labels.reshape(-1, 1)
    mask = (lab == lab.T).astype(jnp.float32)
    adc = jnp.matmul(f, f.T, preferred_element_type=jnp.float32) / temperature
    logits_mask = jnp.ones_like(mask) - jnp.eye(B, dtype=jnp.float32)
    mask = mask * logits_mask
    exp_logits = jnp.exp(adc) * logits_mask
    log_prob = adc - jnp.log(exp_logits.sum(1, keepdims=True) + 1e-8)
    mean_log_prob_pos = (mask * log_prob).sum(1) / jnp.clip(mask.sum(1), 1.0, None)
    return -mean_log_prob_pos.mean()


if __name__ == "__main__":
    key = jax.random.PRNGKey(0)

    def make_inputs(k, B, D, n_cls=3):
        kf, kl = jax.random.split(k)
        f = jax.random.normal(kf, (B, D), dtype=jnp.float32)
        f = f / jnp.linalg.norm(f, axis=1, keepdims=True)   # typical SupCon inputs
        lab = jax.random.randint(kl, (B,), 0, n_cls, dtype=jnp.int32)
        return f, lab

    k1, k2, k3 = jax.random.split(key, 3)

    # 1) Tiny single-tile f32 path (exact match to the reference).
    feat, lab = make_inputs(k1, B=8, D=64)
    loss = jax.block_until_ready(supcon_loss(feat, lab, temperature=0.07))
    ref = _supcon_loss_ref(feat, lab, temperature=0.07)
    assert jnp.allclose(loss, ref, rtol=1e-4, atol=1e-4), (loss, ref)

    # 2) Real 3x3 grid with padding: exercises the maskless fast path, the diagonal
    #    mask path, the padded-column path and the decoupled TQ/TK plumbing.
    feat2, lab2 = make_inputs(k2, B=260, D=72)
    loss2 = jax.block_until_ready(
        supcon_loss(feat2, lab2, temperature=0.07, block_q=128, block_k=128))
    ref2 = _supcon_loss_ref(feat2, lab2, temperature=0.07)
    assert jnp.allclose(loss2, ref2, rtol=1e-4, atol=1e-4), (loss2, ref2)

    # 3) bf16 MXU path with generation-default tiles, checked against the f32 truth.
    feat3, lab3 = make_inputs(k3, B=130, D=64)
    loss3 = jax.block_until_ready(
        supcon_loss(feat3, lab3, temperature=0.07, compute_dtype=jnp.bfloat16))
    ref3 = _supcon_loss_ref(feat3, lab3, temperature=0.07)
    assert jnp.allclose(loss3, ref3, rtol=5e-2, atol=5e-2), (loss3, ref3)

    print("KERNEL_OK")
</pallas_src>

<mosaic_0001>
module attributes {stable_mosaic.version = 11 : i64} {
  func.func @_supcon_kernel(%arg0: i32, %arg1: i32, %arg2: memref<8x128xf32, #tpu.memory_space<vmem>>, %arg3: memref<8x128xf32, #tpu.memory_space<vmem>>, %arg4: memref<8x1xi32, #tpu.memory_space<vmem>>, %arg5: memref<1x8xi32, #tpu.memory_space<vmem>>, %arg6: memref<8x1xf32, #tpu.memory_space<vmem>>, %arg7: memref<8x8xf32, #tpu.memory_space<vmem>>, %arg8: memref<8x8xf32, #tpu.memory_space<vmem>>, %arg9: memref<8x8xf32, #tpu.memory_space<vmem>>) attributes {dimension_semantics = [#tpu.dimension_semantics<parallel>, #tpu.dimension_semantics<arbitrary>], iteration_bounds = array<i64: 1, 1>, scalar_prefetch = 0 : i64, scratch_operands = 3 : i64, tpu.core_type = #tpu.core_type<tc>, window_params = [{transform_indices = @transform_0, window_bounds = array<i64: 8, 128>}, {transform_indices = @transform_1, window_bounds = array<i64: 8, 128>}, {transform_indices = @transform_2, window_bounds = array<i64: 8, 1>}, {transform_indices = @transform_3, window_bounds = array<i64: 1, 8>}, {transform_indices = @transform_4, window_bounds = array<i64: 8, 1>}]} {
    %c0_i32 = arith.constant 0 : i32
    %0 = arith.cmpi eq, %arg1, %c0_i32 : i32
    %1 = arith.extui %0 : i1 to i32
    %c0_i32_0 = arith.constant 0 : i32
    %2 = arith.cmpi ne, %1, %c0_i32_0 : i32
    scf.if %2 {
      %cst_13 = arith.constant 0.000000e+00 : f32
      %24 = vector.broadcast %cst_13 : f32 to vector<8x8xf32>
      %c0_14 = arith.constant 0 : index
      %c0_15 = arith.constant 0 : index
      %25 = vector.load %arg7[%c0_14, %c0_15] : memref<8x8xf32, #tpu.memory_space<vmem>>, vector<8x8xf32>
      tpu.vector_store %arg7[%c0_14, %c0_15], %24 {strides = array<i32>} : memref<8x8xf32, #tpu.memory_space<vmem>>, vector<8x8xf32>,
      %cst_16 = arith.constant 0.000000e+00 : f32
      %26 = vector.broadcast %cst_16 : f32 to vector<8x8xf32>
      %c0_17 = arith.constant 0 : index
      %c0_18 = arith.constant 0 : index
      %27 = vector.load %arg8[%c0_17, %c0_18] : memref<8x8xf32, #tpu.memory_space<vmem>>, vector<8x8xf32>
      tpu.vector_store %arg8[%c0_17, %c0_18], %26 {strides = array<i32>} : memref<8x8xf32, #tpu.memory_space<vmem>>, vector<8x8xf32>,
      %cst_19 = arith.constant 0.000000e+00 : f32
      %28 = vector.broadcast %cst_19 : f32 to vector<8x8xf32>
      %c0_20 = arith.constant 0 : index
      %c0_21 = arith.constant 0 : index
      %29 = vector.load %arg9[%c0_20, %c0_21] : memref<8x8xf32, #tpu.memory_space<vmem>>, vector<8x8xf32>
      tpu.vector_store %arg9[%c0_20, %c0_21], %28 {strides = array<i32>} : memref<8x8xf32, #tpu.memory_space<vmem>>, vector<8x8xf32>,
    } else {
    }
    %c0 = arith.constant 0 : index
    %c0_1 = arith.constant 0 : index
    %3 = vector.load %arg2[%c0, %c0_1] : memref<8x128xf32, #tpu.memory_space<vmem>>, vector<8x128xf32>
    %c0_2 = arith.constant 0 : index
    %c0_3 = arith.constant 0 : index
    %4 = vector.load %arg3[%c0_2, %c0_3] : memref<8x128xf32, #tpu.memory_space<vmem>>, vector<8x128xf32>
    %cst = arith.constant dense<0.000000e+00> : vector<8x8xf32>
    %5 = tpu.matmul %3, %4, %cst {dimension_numbers = #tpu.dot_dimension_numbers<[1], [1], [0], [0], [0, 0, 1, 0], [], []>} : vector<8x128xf32>, vector<8x128xf32>, vector<8x8xf32> -> vector<8x8xf32>
    %c0_4 = arith.constant 0 : index
    %c0_5 = arith.constant 0 : index
    %6 = vector.load %arg4[%c0_4, %c0_5] : memref<8x1xi32, #tpu.memory_space<vmem>>, vector<8x1xi32>
    %c0_6 = arith.constant 0 : index
    %c0_7 = arith.constant 0 : index
    %7 = vector.load %arg5[%c0_6, %c0_7] : memref<1x8xi32, #tpu.memory_space<vmem>>, vector<1x8xi32>
    %8 = vector.broadcast %6 : vector<8x1xi32> to vector<8x8xi32>
    %9 = vector.broadcast %7 : vector<1x8xi32> to vector<8x8xi32>
    %10 = arith.cmpi eq, %8, %9 : vector<8x8xi32>
    %c1_i32 = arith.constant 1 : i32
    %11 = arith.muli %arg0, %c1_i32 : i32
    %12 = arith.cmpi sge, %arg1, %11 : i32
    %c1_i32_8 = arith.constant 1 : i32
    %13 = arith.addi %11, %c1_i32_8 : i32
    %14 = arith.cmpi slt, %arg1, %13 : i32
    %15 = arith.andi %12, %14 : i1
    %16 = arith.extui %15 : i1 to i32
    %c0_i32_9 = arith.constant 0 : i32
    %17 = arith.cmpi ne, %16, %c0_i32_9 : i32
    scf.if %17 {
      %c8_i32 = arith.constant 8 : i32
      %24 = arith.muli %arg0, %c8_i32 : i32
      %25 = tpu.iota {dimensions = array<i32: 0>} : vector<8x8xi32>
      %26 = vector.broadcast %24 : i32 to vector<8x8xi32>
      %27 = arith.addi %26, %25 : vector<8x8xi32>
      %c8_i32_13 = arith.constant 8 : i32
      %28 = arith.muli %arg1, %c8_i32_13 : i32
      %29 = tpu.iota {dimensions = array<i32: 1>} : vector<8x8xi32>
      %30 = vector.broadcast %28 : i32 to vector<8x8xi32>
      %31 = arith.addi %30, %29 : vector<8x8xi32>
      %32 = arith.cmpi ne, %27, %31 : vector<8x8xi32>
      %33 = arith.andi %10, %32 : vector<8x8xi1>
      %34 = math.exp %5 : vector<8x8xf32>
      %cst_14 = arith.constant 0.000000e+00 : f32
      %35 = vector.broadcast %cst_14 : f32 to vector<8x8xf32>
      %36 = arith.select %32, %34, %35 : vector<8x8xi1>, vector<8x8xf32>
      %cst_15 = arith.constant 0.000000e+00 : f32
      %37 = vector.broadcast %cst_15 : f32 to vector<8x8xf32>
      %38 = arith.select %33, %5, %37 : vector<8x8xi1>, vector<8x8xf32>
      %39 = arith.extui %33 : vector<8x8xi1> to vector<8x8xi32>
      %40 = arith.sitofp %39 : vector<8x8xi32> to vector<8x8xf32>
      %c0_16 = arith.constant 0 : index
      %c0_17 = arith.constant 0 : index
      %41 = vector.load %arg7[%c0_16, %c0_17] : memref<8x8xf32, #tpu.memory_space<vmem>>, vector<8x8xf32>
      %42 = arith.addf %41, %36 : vector<8x8xf32>
      %c0_18 = arith.constant 0 : index
      %c0_19 = arith.constant 0 : index
      %43 = vector.load %arg7[%c0_18, %c0_19] : memref<8x8xf32, #tpu.memory_space<vmem>>, vector<8x8xf32>
      tpu.vector_store %arg7[%c0_18, %c0_19], %42 {strides = array<i32>} : memref<8x8xf32, #tpu.memory_space<vmem>>, vector<8x8xf32>,
      %c0_20 = arith.constant 0 : index
      %c0_21 = arith.constant 0 : index
      %44 = vector.load %arg8[%c0_20, %c0_21] : memref<8x8xf32, #tpu.memory_space<vmem>>, vector<8x8xf32>
      %45 = arith.addf %44, %38 : vector<8x8xf32>
      %c0_22 = arith.constant 0 : index
      %c0_23 = arith.constant 0 : index
      %46 = vector.load %arg8[%c0_22, %c0_23] : memref<8x8xf32, #tpu.memory_space<vmem>>, vector<8x8xf32>
      tpu.vector_store %arg8[%c0_22, %c0_23], %45 {strides = array<i32>} : memref<8x8xf32, #tpu.memory_space<vmem>>, vector<8x8xf32>,
      %c0_24 = arith.constant 0 : index
      %c0_25 = arith.constant 0 : index
      %47 = vector.load %arg9[%c0_24, %c0_25] : memref<8x8xf32, #tpu.memory_space<vmem>>, vector<8x8xf32>
      %48 = arith.addf %47, %40 : vector<8x8xf32>
      %c0_26 = arith.constant 0 : index
      %c0_27 = arith.constant 0 : index
      %49 = vector.load %arg9[%c0_26, %c0_27] : memref<8x8xf32, #tpu.memory_space<vmem>>, vector<8x8xf32>
      tpu.vector_store %arg9[%c0_26, %c0_27], %48 {strides = array<i32>} : memref<8x8xf32, #tpu.memory_space<vmem>>, vector<8x8xf32>,
    } else {
    }
    %true = arith.constant true
    %18 = arith.xori %15, %true : i1
    %19 = arith.extui %18 : i1 to i32
    %c0_i32_10 = arith.constant 0 : i32
    %20 = arith.cmpi ne, %19, %c0_i32_10 : i32
    scf.if %20 {
      %24 = math.exp %5 : vector<8x8xf32>
      %cst_13 = arith.constant 0.000000e+00 : f32
      %25 = vector.broadcast %cst_13 : f32 to vector<8x8xf32>
      %26 = arith.select %10, %5, %25 : vector<8x8xi1>, vector<8x8xf32>
      %27 = arith.extui %10 : vector<8x8xi1> to vector<8x8xi32>
      %28 = arith.sitofp %27 : vector<8x8xi32> to vector<8x8xf32>
      %c0_14 = arith.constant 0 : index
      %c0_15 = arith.constant 0 : index
      %29 = vector.load %arg7[%c0_14, %c0_15] : memref<8x8xf32, #tpu.memory_space<vmem>>, vector<8x8xf32>
      %30 = arith.addf %29, %24 : vector<8x8xf32>
      %c0_16 = arith.constant 0 : index
      %c0_17 = arith.constant 0 : index
      %31 = vector.load %arg7[%c0_16, %c0_17] : memref<8x8xf32, #tpu.memory_space<vmem>>, vector<8x8xf32>
      tpu.vector_store %arg7[%c0_16, %c0_17], %30 {strides = array<i32>} : memref<8x8xf32, #tpu.memory_space<vmem>>, vector<8x8xf32>,
      %c0_18 = arith.constant 0 : index
      %c0_19 = arith.constant 0 : index
      %32 = vector.load %arg8[%c0_18, %c0_19] : memref<8x8xf32, #tpu.memory_space<vmem>>, vector<8x8xf32>
      %33 = arith.addf %32, %26 : vector<8x8xf32>
      %c0_20 = arith.constant 0 : index
      %c0_21 = arith.constant 0 : index
      %34 = vector.load %arg8[%c0_20, %c0_21] : memref<8x8xf32, #tpu.memory_space<vmem>>, vector<8x8xf32>
      tpu.vector_store %arg8[%c0_20, %c0_21], %33 {strides = array<i32>} : memref<8x8xf32, #tpu.memory_space<vmem>>, vector<8x8xf32>,
      %c0_22 = arith.constant 0 : index
      %c0_23 = arith.constant 0 : index
      %35 = vector.load %arg9[%c0_22, %c0_23] : memref<8x8xf32, #tpu.memory_space<vmem>>, vector<8x8xf32>
      %36 = arith.addf %35, %28 : vector<8x8xf32>
      %c0_24 = arith.constant 0 : index
      %c0_25 = arith.constant 0 : index
      %37 = vector.load %arg9[%c0_24, %c0_25] : memref<8x8xf32, #tpu.memory_space<vmem>>, vector<8x8xf32>
      tpu.vector_store %arg9[%c0_24, %c0_25], %36 {strides = array<i32>} : memref<8x8xf32, #tpu.memory_space<vmem>>, vector<8x8xf32>,
    } else {
    }
    %c0_i32_11 = arith.constant 0 : i32
    %21 = arith.cmpi eq, %arg1, %c0_i32_11 : i32
    %22 = arith.extui %21 : i1 to i32
    %c0_i32_12 = arith.constant 0 : i32
    %23 = arith.cmpi ne, %22, %c0_i32_12 : i32
    scf.if %23 {
      %c0_13 = arith.constant 0 : index
      %c0_14 = arith.constant 0 : index
      %24 = vector.load %arg7[%c0_13, %c0_14] : memref<8x8xf32, #tpu.memory_space<vmem>>, vector<8x8xf32>
      %cst_15 = arith.constant dense<0.000000e+00> : vector<8xf32>
      %25 = vector.multi_reduction <add>, %24, %cst_15 [1] : vector<8x8xf32> to vector<8xf32>
      %26 = vector.shape_cast %25 : vector<8xf32> to vector<8x1xf32>
      %cst_16 = arith.constant 9.99999993E-9 : f32
      %27 = vector.broadcast %cst_16 : f32 to vector<8x1xf32>
      %28 = arith.addf %26, %27 : vector<8x1xf32>
      %c0_17 = arith.constant 0 : index
      %c0_18 = arith.constant 0 : index
      %29 = vector.load %arg9[%c0_17, %c0_18] : memref<8x8xf32, #tpu.memory_space<vmem>>, vector<8x8xf32>
      %cst_19 = arith.constant dense<0.000000e+00> : vector<8xf32>
      %30 = vector.multi_reduction <add>, %29, %cst_19 [1] : vector<8x8xf32> to vector<8xf32>
      %31 = vector.shape_cast %30 : vector<8xf32> to vector<8x1xf32>
      %c0_20 = arith.constant 0 : index
      %c0_21 = arith.constant 0 : index
      %32 = vector.load %arg8[%c0_20, %c0_21] : memref<8x8xf32, #tpu.memory_space<vmem>>, vector<8x8xf32>
      %cst_22 = arith.constant dense<0.000000e+00> : vector<8xf32>
      %33 = vector.multi_reduction <add>, %32, %cst_22 [1] : vector<8x8xf32> to vector<8xf32>
      %34 = vector.shape_cast %33 : vector<8xf32> to vector<8x1xf32>
      %35 = math.log %28 : vector<8x1xf32>
      %36 = arith.mulf %35, %31 : vector<8x1xf32>
      %37 = arith.subf %34, %36 : vector<8x1xf32>
      %cst_23 = arith.constant 1.000000e+00 : f32
      %38 = vector.broadcast %cst_23 : f32 to vector<8x1xf32>
      %39 = arith.maximumf %31, %38 : vector<8x1xf32>
      %40 = arith.divf %37, %39 : vector<8x1xf32>
      %c0_24 = arith.constant 0 : index
      %c0_25 = arith.constant 0 : index
      %41 = vector.load %arg6[%c0_24, %c0_25] : memref<8x1xf32, #tpu.memory_space<vmem>>, vector<8x1xf32>
      tpu.vector_store %arg6[%c0_24, %c0_25], %40 {strides = array<i32>} : memref<8x1xf32, #tpu.memory_space<vmem>>, vector<8x1xf32>,
    } else {
    }
    return
  }
  func.func @transform_0(%arg0: i32, %arg1: i32) -> (i32, i32) {
    %c0_i32 = arith.constant 0 : i32
    %c0_i32_0 = arith.constant 0 : i32
    return %arg0, %c0_i32 : i32, i32
  }
  func.func @transform_1(%arg0: i32, %arg1: i32) -> (i32, i32) {
    %c0_i32 = arith.constant 0 : i32
    %c0_i32_0 = arith.constant 0 : i32
    return %arg1, %c0_i32 : i32, i32
  }
  func.func @transform_2(%arg0: i32, %arg1: i32) -> (i32, i32) {
    %c0_i32 = arith.constant 0 : i32
    %c0_i32_0 = arith.constant 0 : i32
    return %arg0, %c0_i32 : i32, i32
  }
  func.func @transform_3(%arg0: i32, %arg1: i32) -> (i32, i32) {
    %c0_i32 = arith.constant 0 : i32
    %c0_i32_0 = arith.constant 0 : i32
    return %c0_i32, %arg1 : i32, i32
  }
  func.func @transform_4(%arg0: i32, %arg1: i32) -> (i32, i32) {
    %c0_i32 = arith.constant 0 : i32
    %c0_i32_0 = arith.constant 0 : i32
    return %arg0, %c0_i32 : i32, i32
  }
}

</mosaic_0001>

<bundles_post_ra>
// kernel: tpu_custom_call.1
= control target key start
LH: loop header
LB: loop body
LE: loop exit
PB: predicated region body
PF: predicated region fallthrough
CT: control target
= control target key end

     0   :  { %9 = vsyncpa [#allocation6], 0  ;;  %s248_s15 = smov [#allocation5]   ;;  %s312_s0 = inlined_call_operand.vmem [shape: f32[8,128], index: 0, kind: input, shape index: {}]   ;;  %s313_s1 = inlined_call_operand.hbm [shape: f32[8,128], index: 1, kind: input, shape index: {}]   ;;  %s314_s2 = inlined_call_operand.vmem [shape: s32[8,1], index: 2, kind: input, shape index: {}]   ;;  %s315_s3 = inlined_call_operand.vmem [shape: s32[1,8], index: 3, kind: input, shape index: {}]   ;;  %s316_s4 = inlined_call_operand.vmem [shape: f32[8,1], index: 4, kind: output, shape index: {}]  }
   0x1   :  { %s18_s16 = sshll.u32 %s248_s15, 4  ;;  %s224_s19 = scalar_lea.hbm %s313_s1, 128  ;;  %s19_s16 = int_to_ptr.vmem [resolvable:$true] %s18_s16 }
   0x2   :  { %p225_p0 = scmp.ne.s32.totalorder %s313_s1, %s224_s19  ;;  %p228_p1 = scmp.lt.u32.totalorder %s224_s19, %s313_s1 }
   0x4   :  { %p230_p2 = pnand %p228_p1, %p225_p0 }
   0x6   :  { %233 = shalt.err (!%p230_p2)
}
   0x7   :  { %s234_s24 = scalar_lea.vmem %s19_s16, 128  ;;  %p239_p4 = scmp.lt.s32.totalorder %s19_s16, %s19_s16 }
   0x8   :  { %p235_p3 = scmp.ne.s32.totalorder %s19_s16, %s234_s24  ;;  %p240_p5 = scmp.lt.s32.totalorder %s234_s24, %s234_s24 }
   0xa   :  { %p241_p6 = por %p240_p5, %p239_p4 }
   0xc   :  { %p242_p7 = pnand %p241_p6, %p235_p3 }
   0xe   :  { %245 = shalt.err (!%p242_p7)
}
   0xf   :  { %21 = dma.hbm_to_vmem [thread:$0]  %s313_s1, 128, %s19_s16, [#allocation6]  }
  0x10   :  { %246 = dma.done.wait [#allocation6], 128  }
  0x11   :  { %247 = vsyncadd [#allocation6], 4294967168  ;;  %vm33_vm0 = vcmask 64512   ;;  %v249_v0 = vmov 0.0   ;;  %vm250_vm1 = vmmov 0   ;;  %v251_v1 = vmov 0  }
  0x12   :  { %34 = vst.msk [vmem:[#allocation2] sm:$0xff] %vm33_vm0, %v249_v0  ;;  %208 = vmatprep.subr.mxu0 %v249_v0  ;;  %35 = vst.msk [vmem:[#allocation3] sm:$0xff] %vm33_vm0, %v249_v0  ;;  %210 = vmatprep.mubr.msk.f32.mxu0 %vm250_vm1, %v249_v0  ;;  %v38_v2 = vld [vmem:[#allocation5] sm:$0xff]  ;;  %v109_v3 = vld [vmem:[%s314_s2] sm:$0xff]  ;;  %v127_v5 = vlaneseq  ;;  %vm196_vm5 = vcmask 7168  }
  0x13   :  { %36 = vst.msk [vmem:[#allocation4] sm:$0xff] %vm33_vm0, %v249_v0  ;;  %217 = vset.pattern.permute.xlu0 %v251_v1  ;;  %209 = vmatpush3.xpose.msra.mxu0 %v38_v2  ;;  %v37_v4 = vld [vmem:[%s312_s0] sm:$0xff] }
  0x14   :  { %112 = vperm.xlu0 %217, %v109_v3   ;;  %v128_v6 = vshrl.u32 %v127_v5, 7  ;;  %v133_v7 = vand.u32 127, %v127_v5  ;;  %v203_v8 = vld [vmem:[%s315_s3] ss:$0 sm:$0xff] }
  0x16   :  { %211 = vmatmul.mubr.f32.vlgmr.msra.gmra.mrb[0].mxu0 %v37_v4  ;;  %vm136_vm2 = vcmp.ne.s32.totalorder %v128_v6, %v133_v7 }
  0x19   :  { %v148_v15 = vld [vmem:[#allocation3] sm:$0xff]  ;;  %v144_v22 = vld [vmem:[#allocation2] sm:$0xff] }
  0x1a   :  { %v151_v10 = vld [vmem:[#allocation4] sm:$0xff] }
  0x93   :  { %v113_v9 = vpop.permute.xlu0 %112 }
  0x94   :  { %vm118_vm3 = vcmp.eq.s32.totalorder %v113_v9, %v203_v8 }
  0x95   :  { %vm137_vm4 = vmand %vm118_vm3, %vm136_vm2 }
  0x96   :  { %v204_v11 = vsel %vm137_vm4, 1.0, %v249_v0 }
  0x97   :  { %v152_v12 = vadd.f32 %v204_v11, %v151_v10 }
  0x99   :  { %153 = vst.msk [vmem:[#allocation4] sm:$0xff] %vm33_vm0, %v152_v12 }
  0xa0   :  { %v181_v13 = vld [vmem:[#allocation4] sm:$0xff] }
  0xa1   :  { %v182_v14 = vsel %vm33_vm0, %v181_v13, 0.0 }
  0xa2   :  { %183 = vadd.xlane.f32.xlu1 %v182_v14 }
  0xe9   :  { %v105_v16 = vpop.f32.mrb[0].mxu0 }
  0xea   :  { %v138_v17 = vmul.f32 1.442695, %v105_v16  ;;  %v141_v18 = vsel %vm137_vm4, %v105_v16, 0.0  ;;  %v212_v19 = vpop.f32.mrb[1].mxu0 }
  0xeb   :  { %v149_v20 = vadd.f32 %v148_v15, %v141_v18 }
  0xec   :  { %218 = vpow2.f32 %v138_v17 }
  0xed   :  { %150 = vst.msk [vmem:[#allocation3] sm:$0xff] %vm33_vm0, %v149_v20 }
  0xf4   :  { %v185_v21 = vld [vmem:[#allocation3] sm:$0xff] }
  0xf5   :  { %v186_v23 = vsel %vm33_vm0, %v185_v21, 0.0 }
  0xf6   :  { %v219_v24 = vpop.eup %218  ;;  %187 = vadd.xlane.f32.xlu1 %v186_v23 }
  0xf7   :  { %v140_v25 = vsel %vm136_vm2, %v219_v24, 0.0 }
  0xf8   :  { %v145_v26 = vadd.f32 %v144_v22, %v140_v25 }
  0xfa   :  { %147 = vst.msk [vmem:[#allocation2] sm:$0xff] %vm33_vm0, %v145_v26 }
 0x101   :  { %v175_v27 = vld [vmem:[#allocation2] sm:$0xff] }
 0x102   :  { %v177_v28 = vsel %vm33_vm0, %v175_v27, 0.0 }
 0x103   :  { %178 = vadd.xlane.f32.xlu0 %v177_v28 }
 0x12f   :  { %v184_v31 = vpop.xlane.xlu1 %183 }
 0x130   :  { %v193_v32 = vmax.f32 %v184_v31, 1.0 }
 0x183   :  { %v188_v37 = vpop.xlane.xlu1 %187 }
 0x190   :  { %v179_v29 = vpop.xlane.xlu0 %178 }
 0x191   :  { %v180_v30 = vadd.f32 1e-08, %v179_v29 }
 0x193   :  { %220 = vlog2.f32 %v180_v30 }
 0x194   :  { %222 = vrcp.f32 %v193_v32 }
 0x19d   :  { %v221_v33 = vpop.eup %220 }
 0x19e   :  { %v190_v34 = vmul.f32 0.6931472, %v221_v33  ;;  %v223_v36 = vpop.eup %222 }
 0x1a0   :  { %v191_v35 = vmul.f32 %v190_v34, %v184_v31 }
 0x1a2   :  { %v192_v38 = vsub.f32 %v188_v37, %v191_v35 }
 0x1a4   :  { %v195_v39 = vmul.f32 %v223_v36, %v192_v38 }
 0x1a6   :  { %197 = vst.msk [vmem:[%s316_s4] sm:$0xff] %vm196_vm5, %v195_v39 }
 0x1a7   :  { %202 = vsyncpa [#allocation6], 1 }

</bundles_post_ra>
